<compile_context>
chip_gen: v7x
topology: tpu7x:2x2x1
jax: 0.10.0
libtpu: 0.0.40
codegen_flags: <defaults>
</compile_context>

<pallas_src>
import math
from functools import lru_cache, partial

import numpy as np

import jax
import jax.numpy as jnp
from jax.experimental import pallas as pl
from jax.experimental.pallas import tpu as pltpu


def _round_up(x: int, m: int) -> int:
    return ((x + m - 1) // m) * m


# ----------------------------------------------------------------------------
# Host-side weight construction: exact replica of ATen's _compute_weights_aa
# for the bilinear (triangle) filter, align_corners=False, antialias=True.
# ----------------------------------------------------------------------------
@lru_cache(maxsize=64)
def _aa_bilinear_weight_matrix(in_size: int, out_size: int, scale_factor: float) -> np.ndarray:
    scale = 1.0 / scale_factor            # resampling scale (align_corners=False)
    if scale >= 1.0:                      # downsampling -> widen triangle support
        support = scale
        invscale = 1.0 / scale
    else:
        support = 1.0
        invscale = 1.0
    W = np.zeros((out_size, in_size), dtype=np.float64)
    for i in range(out_size):
        center = scale * (i + 0.5)
        xmin = max(int(center - support + 0.5), 0)        # int() == C++ trunc here
        xmax = min(int(center + support + 0.5), in_size)
        ws = []
        for j in range(xmax - xmin):
            a = abs((j + xmin - center + 0.5) * invscale)
            ws.append(1.0 - a if a < 1.0 else 0.0)
        total = sum(ws)
        if total > 0.0:
            for j, w in enumerate(ws):
                W[i, xmin + j] = w / total
    return W.astype(np.float32)


@lru_cache(maxsize=64)
def _build_weights(H, W, OH, OW, OHp, OWp, B, scale_factor, mxu_bf16):
    """Padded, device-resident resize weights (cached across calls)."""
    wdt = jnp.bfloat16 if mxu_bf16 else jnp.float32

    ww = _aa_bilinear_weight_matrix(W, OW, scale_factor)         # (OW, W)
    wwt = np.zeros((W, OWp), dtype=np.float32)                   # lane-dense pad
    wwt[:, :OW] = ww.T

    wh = _aa_bilinear_weight_matrix(H, OH, scale_factor)         # (OH, H)
    wh_bd = np.zeros((B * OHp, B * H), dtype=np.float32)         # block-diagonal
    for b in range(B):
        wh_bd[b * OHp:b * OHp + OH, b * H:(b + 1) * H] = wh

    return jnp.asarray(wwt, dtype=wdt), jnp.asarray(wh_bd, dtype=wdt)


# ----------------------------------------------------------------------------
# Pallas kernel: B slabs (per tensor) per grid step -> two large MXU matmuls
# per tensor, lane-aligned outputs, weights VMEM-resident.
# ----------------------------------------------------------------------------
def _make_resize_kernel(n_tensors: int):
    def kernel(*refs):
        x_refs = refs[:n_tensors]
        wwt_ref = refs[n_tensors]
        whbd_ref = refs[n_tensors + 1]
        o_refs = refs[n_tensors + 2:]
        mxu_dt = wwt_ref.dtype
        for x_ref, o_ref in zip(x_refs, o_refs):
            x = x_ref[...].astype(mxu_dt)                                  # cast in VMEM
            # Stage 1: width contraction, f32 accumulation on the MXU.
            t = jnp.dot(x, wwt_ref[...], preferred_element_type=jnp.float32)
            # Stage 2: height contraction for all B slabs at once (block-diag Wh).
            t = t.astype(mxu_dt)
            out = jnp.dot(whbd_ref[...], t, preferred_element_type=jnp.float32)
            o_ref[...] = out.astype(o_ref.dtype)
    return kernel


def _resize_2d(arrs, wwt, wh_bd, *, H, W, B, total, OH, OW):
    """arrs: list of (total*H, W) slab stacks -> list of (total, OH, OW)."""
    n = len(arrs)
    OWp = wwt.shape[1]
    OHp = wh_bd.shape[0] // B

    total_p = _round_up(total, B)
    if total_p != total:                        # rarely hit (B prefers divisors)
        arrs = [jnp.pad(a, ((0, (total_p - total) * H), (0, 0))) for a in arrs]
    steps = total_p // B

    x_spec = pl.BlockSpec((B * H, W), lambda i: (i, 0))
    o_spec = pl.BlockSpec((B * OHp, OWp), lambda i: (i, 0))

    outs = pl.pallas_call(
        _make_resize_kernel(n),
        out_shape=tuple(jax.ShapeDtypeStruct((total_p * OHp, OWp), a.dtype) for a in arrs),
        grid=(steps,),
        in_specs=[x_spec] * n + [
            pl.BlockSpec((W, OWp), lambda i: (0, 0)),            # constant -> VMEM-resident
            pl.BlockSpec((B * OHp, B * H), lambda i: (0, 0)),    # constant -> VMEM-resident
        ],
        out_specs=tuple(o_spec for _ in range(n)),
        compiler_params=pltpu.CompilerParams(
            dimension_semantics=("parallel",),
            vmem_limit_bytes=32 * 1024 * 1024,
        ),
    )(*arrs, wwt, wh_bd)
    if not isinstance(outs, (tuple, list)):
        outs = (outs,)

    # Slice off lane/sublane/slab padding (layout plumbing only).
    return [o.reshape(total_p, OHp, OWp)[:total, :OH, :OW] for o in outs]


def _choose_block_slabs(total, H, W, OHp, OWp, n_tensors):
    """Slabs per grid step: fill VMEM, B*H % 8 == 0, prefer divisor of `total`,
    keep >= 2 parallel grid steps when possible (v7x's 2 TCs)."""
    g = 8 // math.gcd(H, 8)                               # sublane-alignment factor
    budget = 8 * 1024 * 1024                              # double-buffered in+out blocks
    per_slab = 2 * 4 * n_tensors * (H * W + OHp * OWp)
    b_max = max(1, budget // max(per_slab, 1))
    wh_budget = 2 * 1024 * 1024                           # block-diag Wh (double-buffered)
    b_max = min(b_max, max(1, int(math.sqrt(wh_budget / (4.0 * OHp * H)))))
    if total >= 2 * g:
        b_max = min(b_max, total // 2)                    # >= 2 grid steps for 2 TCs
    b_max = max(g, (b_max // g) * g)
    for b in range(b_max, g - 1, -g):                     # prefer no slab padding
        if total % b == 0:
            return b
    return b_max


@partial(jax.jit, static_argnames=("OH", "OW", "B"))
def _downsample_pair_jit(inp, tgt, wwt, wh_bd, OH, OW, B):
    N, C, H, W = inp.shape
    total = N * C
    outs = _resize_2d([inp.reshape(total * H, W), tgt.reshape(total * H, W)],
                      wwt, wh_bd, H=H, W=W, B=B, total=total, OH=OH, OW=OW)
    return tuple(o.reshape(N, C, OH, OW) for o in outs)


@partial(jax.jit, static_argnames=("OH", "OW", "B"))
def _downsample_single_jit(x, wwt, wh_bd, OH, OW, B):
    N, C, H, W = x.shape
    total = N * C
    (out,) = _resize_2d([x.reshape(total * H, W)],
                        wwt, wh_bd, H=H, W=W, B=B, total=total, OH=OH, OW=OW)
    return out.reshape(N, C, OH, OW)


def _plan(shape, scale_factor):
    N, C, H, W = shape
    OH = int(math.floor(H * scale_factor))
    OW = int(math.floor(W * scale_factor))
    OHp = _round_up(max(OH, 1), 8)
    OWp = _round_up(max(OW, 1), 128)
    return N, C, H, W, OH, OW, OHp, OWp


def _mxu_bf16_default():
    # bf16 MXU inputs run at full rate on v6e/v7x; keep f32 accumulation.
    try:
        kind = jax.devices()[0].device_kind.lower()
    except Exception:
        return False
    return any(tag in kind for tag in ("v6", "v7", "7x"))


# ----------------------------------------------------------------------------
# Module-equivalent wrapper
# ----------------------------------------------------------------------------
class DiffPairRandomDownsample:
    """JAX/Pallas port of nunif's DiffPairRandomDownsample (forward only)."""

    def __init__(self, scale_factor_min=0.5, scale_factor_max=1.0,
                 training=False, seed=0, mxu_bf16=None):
        self.scale_factor_min = scale_factor_min
        self.scale_factor_max = scale_factor_max
        self.training = training
        # TODO(synk): training-mode random scale uses host RNG — the output shape
        # is data-dependent, so the scale must be a concrete Python float at trace time.
        self._rng = np.random.RandomState(seed)
        self.mxu_bf16 = _mxu_bf16_default() if mxu_bf16 is None else bool(mxu_bf16)

    def _downsample(self, x, scale_factor):
        N, C, H, W, OH, OW, OHp, OWp = _plan(x.shape, scale_factor)
        B = _choose_block_slabs(N * C, H, W, OHp, OWp, n_tensors=1)
        wwt, wh_bd = _build_weights(H, W, OH, OW, OHp, OWp, B,
                                    float(scale_factor), self.mxu_bf16)
        return _downsample_single_jit(x, wwt, wh_bd, OH=OH, OW=OW, B=B)

    def __call__(self, input, target):
        if self.training:
            u = float(self._rng.rand())
        else:
            u = 0.5
        scale_factor = ((self.scale_factor_max - self.scale_factor_min) * u
                        + self.scale_factor_min)
        if input.shape == target.shape and input.dtype == target.dtype:
            # Fused path: one pallas_call processing both tensors per grid step;
            # weights DMA'd once / VMEM-resident, no HBM concat pass.
            N, C, H, W, OH, OW, OHp, OWp = _plan(input.shape, scale_factor)
            B = _choose_block_slabs(N * C, H, W, OHp, OWp, n_tensors=2)
            wwt, wh_bd = _build_weights(H, W, OH, OW, OHp, OWp, B,
                                        float(scale_factor), self.mxu_bf16)
            y_in, y_tg = _downsample_pair_jit(input, target, wwt, wh_bd,
                                              OH=OH, OW=OW, B=B)
            return y_in, y_tg
        return (self._downsample(input, scale_factor),
                self._downsample(target, scale_factor))


if __name__ == "__main__":
    key = jax.random.PRNGKey(0)
    k1, k2 = jax.random.split(key)
    x = jax.random.normal(k1, (2, 4, 16, 16), dtype=jnp.float32)
    t = jax.random.normal(k2, (2, 4, 16, 16), dtype=jnp.float32)

    mod = DiffPairRandomDownsample()        # eval mode -> scale_factor = 0.75
    y_in, y_tg = mod(x, t)
    jax.block_until_ready(y_in)
    jax.block_until_ready(y_tg)

    assert y_in.shape == (2, 4, 12, 12), y_in.shape
    assert y_tg.shape == (2, 4, 12, 12), y_tg.shape
    assert y_in.dtype == jnp.float32 and y_tg.dtype == jnp.float32

    # Numerical sanity check vs a dense host reference (tolerance covers the
    # bf16-input / f32-accumulate MXU path used on v6e/v7x).
    sf = 0.75
    wh = _aa_bilinear_weight_matrix(16, 12, sf)
    ww = _aa_bilinear_weight_matrix(16, 12, sf)
    ref_in = np.einsum("oh,nchw,pw->ncop", wh, np.asarray(x, np.float32), ww)
    ref_tg = np.einsum("oh,nchw,pw->ncop", wh, np.asarray(t, np.float32), ww)
    err = max(float(np.max(np.abs(np.asarray(y_in, dtype=np.float32) - ref_in))),
              float(np.max(np.abs(np.asarray(y_tg, dtype=np.float32) - ref_tg))))
    assert err < 0.1, f"max abs error vs reference: {err}"

    print("KERNEL_OK")
</pallas_src>

<mosaic_0001>
module attributes {stable_mosaic.version = 11 : i64} {
  func.func @kernel(%arg0: i32, %arg1: memref<64x16xf32, #tpu.memory_space<vmem>>, %arg2: memref<64x16xf32, #tpu.memory_space<vmem>>, %arg3: memref<16x128xf32, #tpu.memory_space<vmem>>, %arg4: memref<64x64xf32, #tpu.memory_space<vmem>>, %arg5: memref<64x128xf32, #tpu.memory_space<vmem>>, %arg6: memref<64x128xf32, #tpu.memory_space<vmem>>) attributes {dimension_semantics = [#tpu.dimension_semantics<parallel>], iteration_bounds = array<i64: 2>, scalar_prefetch = 0 : i64, scratch_operands = 0 : i64, tpu.core_type = #tpu.core_type<tc>, window_params = [{transform_indices = @transform_0, window_bounds = array<i64: 64, 16>}, {transform_indices = @transform_1, window_bounds = array<i64: 64, 16>}, {pipeline_mode = #tpu.pipeline_mode<synchronous>, transform_indices = @transform_2, window_bounds = array<i64: 16, 128>}, {pipeline_mode = #tpu.pipeline_mode<synchronous>, transform_indices = @transform_3, window_bounds = array<i64: 64, 64>}, {transform_indices = @transform_4, window_bounds = array<i64: 64, 128>}, {transform_indices = @transform_5, window_bounds = array<i64: 64, 128>}]} {
    %c0 = arith.constant 0 : index
    %c0_0 = arith.constant 0 : index
    %0 = vector.load %arg1[%c0, %c0_0] : memref<64x16xf32, #tpu.memory_space<vmem>>, vector<64x16xf32>
    %c0_1 = arith.constant 0 : index
    %c0_2 = arith.constant 0 : index
    %1 = vector.load %arg3[%c0_1, %c0_2] : memref<16x128xf32, #tpu.memory_space<vmem>>, vector<16x128xf32>
    %cst = arith.constant dense<0.000000e+00> : vector<64x128xf32>
    %2 = tpu.matmul %0, %1, %cst {dimension_numbers = #tpu.dot_dimension_numbers<[1], [0], [0], [1], [0, 0, 1, 1], [], []>} : vector<64x16xf32>, vector<16x128xf32>, vector<64x128xf32> -> vector<64x128xf32>
    %c0_3 = arith.constant 0 : index
    %c0_4 = arith.constant 0 : index
    %3 = vector.load %arg4[%c0_3, %c0_4] : memref<64x64xf32, #tpu.memory_space<vmem>>, vector<64x64xf32>
    %cst_5 = arith.constant dense<0.000000e+00> : vector<64x128xf32>
    %4 = tpu.matmul %3, %2, %cst_5 {dimension_numbers = #tpu.dot_dimension_numbers<[1], [0], [0], [1], [0, 0, 1, 1], [], []>} : vector<64x64xf32>, vector<64x128xf32>, vector<64x128xf32> -> vector<64x128xf32>
    %c0_6 = arith.constant 0 : index
    %c0_7 = arith.constant 0 : index
    %5 = vector.load %arg5[%c0_6, %c0_7] : memref<64x128xf32, #tpu.memory_space<vmem>>, vector<64x128xf32>
    tpu.vector_store %arg5[%c0_6, %c0_7], %4 {strides = array<i32>} : memref<64x128xf32, #tpu.memory_space<vmem>>, vector<64x128xf32>,
    %c0_8 = arith.constant 0 : index
    %c0_9 = arith.constant 0 : index
    %6 = vector.load %arg2[%c0_8, %c0_9] : memref<64x16xf32, #tpu.memory_space<vmem>>, vector<64x16xf32>
    %c0_10 = arith.constant 0 : index
    %c0_11 = arith.constant 0 : index
    %7 = vector.load %arg3[%c0_10, %c0_11] : memref<16x128xf32, #tpu.memory_space<vmem>>, vector<16x128xf32>
    %cst_12 = arith.constant dense<0.000000e+00> : vector<64x128xf32>
    %8 = tpu.matmul %6, %7, %cst_12 {dimension_numbers = #tpu.dot_dimension_numbers<[1], [0], [0], [1], [0, 0, 1, 1], [], []>} : vector<64x16xf32>, vector<16x128xf32>, vector<64x128xf32> -> vector<64x128xf32>
    %c0_13 = arith.constant 0 : index
    %c0_14 = arith.constant 0 : index
    %9 = vector.load %arg4[%c0_13, %c0_14] : memref<64x64xf32, #tpu.memory_space<vmem>>, vector<64x64xf32>
    %cst_15 = arith.constant dense<0.000000e+00> : vector<64x128xf32>
    %10 = tpu.matmul %9, %8, %cst_15 {dimension_numbers = #tpu.dot_dimension_numbers<[1], [0], [0], [1], [0, 0, 1, 1], [], []>} : vector<64x64xf32>, vector<64x128xf32>, vector<64x128xf32> -> vector<64x128xf32>
    %c0_16 = arith.constant 0 : index
    %c0_17 = arith.constant 0 : index
    %11 = vector.load %arg6[%c0_16, %c0_17] : memref<64x128xf32, #tpu.memory_space<vmem>>, vector<64x128xf32>
    tpu.vector_store %arg6[%c0_16, %c0_17], %10 {strides = array<i32>} : memref<64x128xf32, #tpu.memory_space<vmem>>, vector<64x128xf32>,
    return
  }
  func.func @transform_0(%arg0: i32) -> (i32, i32) {
    %c0_i32 = arith.constant 0 : i32
    %c0_i32_0 = arith.constant 0 : i32
    return %arg0, %c0_i32 : i32, i32
  }
  func.func @transform_1(%arg0: i32) -> (i32, i32) {
    %c0_i32 = arith.constant 0 : i32
    %c0_i32_0 = arith.constant 0 : i32
    return %arg0, %c0_i32 : i32, i32
  }
  func.func @transform_2(%arg0: i32) -> (i32, i32) {
    %c0_i32 = arith.constant 0 : i32
    %c0_i32_0 = arith.constant 0 : i32
    %c0_i32_1 = arith.constant 0 : i32
    return %c0_i32, %c0_i32_0 : i32, i32
  }
  func.func @transform_3(%arg0: i32) -> (i32, i32) {
    %c0_i32 = arith.constant 0 : i32
    %c0_i32_0 = arith.constant 0 : i32
    %c0_i32_1 = arith.constant 0 : i32
    return %c0_i32, %c0_i32_0 : i32, i32
  }
  func.func @transform_4(%arg0: i32) -> (i32, i32) {
    %c0_i32 = arith.constant 0 : i32
    %c0_i32_0 = arith.constant 0 : i32
    return %arg0, %c0_i32 : i32, i32
  }
  func.func @transform_5(%arg0: i32) -> (i32, i32) {
    %c0_i32 = arith.constant 0 : i32
    %c0_i32_0 = arith.constant 0 : i32
    return %arg0, %c0_i32 : i32, i32
  }
}

</mosaic_0001>

<bundles_post_ra>
// kernel: _downsample_pair_jit.1
= control target key start
LH: loop header
LB: loop body
LE: loop exit
PB: predicated region body
PF: predicated region fallthrough
CT: control target
= control target key end

     0   :  { %s1844_s0 = inlined_call_operand.hbm [shape: f32[128,16], index: 0, kind: input, shape index: {}]   ;;  %s1845_s1 = inlined_call_operand.hbm [shape: f32[128,16], index: 1, kind: input, shape index: {}]   ;;  %s1846_s2 = inlined_call_operand.hbm [shape: f32[16,128], index: 2, kind: input, shape index: {}]   ;;  %s1847_s3 = inlined_call_operand.hbm [shape: f32[64,64], index: 3, kind: input, shape index: {}]   ;;  %s1848_s4 = inlined_call_operand.vmem [shape: f32[128,128], index: 4, kind: output, shape index: {0}]   ;;  %s1849_s5 = inlined_call_operand.vmem [shape: f32[128,128], index: 5, kind: output, shape index: {1}]  }
   0x1   :  { %1855 = sst [smem:[#allocation13_spill]] %s1844_s0 }
   0x2   :  { %11 = vsyncpa [#allocation3], 0 }
   0x3   :  { %13 = vsyncpa [#allocation3 + $0x1], 0 }
   0x4   :  { %14 = vsyncpa [#allocation5], 0 }
   0x5   :  { %16 = vsyncpa [#allocation5 + $0x1], 0 }
   0x6   :  { %17 = vsyncpa [#allocation8], 0  ;;  %s1556_s18 = smov 0   ;;  %s1558_s19 = smov 0  }
   0x7   :  { %s1560_s20 = smov 0   ;;  %s1562_s21 = smov 0  }
   0x8 LB: > { %s1575_s22 = sadd.s32 4294967295, %s1518_s21   ;;  %p43_p0 = scmp.ne.s32.totalorder %s1510_s19, %s1506_s18  ;;  %s1518_s21 = sphi %s1562_s21, %s1871_s21   ;;  %s1514_s20 = sphi %s1560_s20, %s1870_s20   ;;  %s1510_s19 = sphi %s1558_s19, %s1869_s19   ;;  %s1506_s18 = sphi %s1556_s18, %s1868_s18  }
   0x9   : > { %p1850_p1 = scmp.eq.s32.totalorder %s1575_s22, 0  ;;  %p1046_p2 = scmp.ge.s32.totalorder %s1518_s21, 1 }
   0xa   : > { %p174_p3 = scmp.lt.s32.totalorder %s1518_s21, 3  ;;  %s1520_s25 = smov [#allocation6]  }
   0xb   : > { %p1583_p4 = por %p1850_p1, %p43_p0  ;;  %s186_s26 = sshll.u32 %s1520_s25, 4  ;;  %s187_s26 = int_to_ptr.vmem [resolvable:$true] %s186_s26 }
   0xc   : > { %p1587_p5 = pnand %p1046_p2, %p174_p3  ;;  %s1521_s28 = smov [#allocation7]  }
   0xd   : > { %s1856_s23 = scalar_select %p1583_p4, 1, 0 }
   0xe   : > { %s1857_s24 = scalar_select %p1587_p5, 1, 0 }
   0xf   : > { %p1301_p6 = pneg %p1587_p5  ;;  %s199_s29 = sshll.u32 %s1521_s28, 4  ;;  %s1599_s29 = int_to_ptr.vmem [resolvable:$true] %s199_s29 }
  0x10   : > { %s1356_s7 = scalar_lea.hbm %s1846_s2, 256 }
  0x11   : > { %p1595_p7 = pnand %p1301_p6, %p1850_p1  ;;  %p1357_p8 = scmp.ne.s32.totalorder %s1846_s2, %s1356_s7 }
  0x12   : > { %p1363_p12 = scmp.lt.u32.totalorder %s1356_s7, %s1846_s2 }
  0x13   : > { %p1358_p9 = pneg %p1595_p7 }
  0x15   : > { %p1359_p10 = pnand %p1358_p9, %p1357_p8 }
  0x17   : > { %p1360_p11 = pneg %p1359_p10 }
  0x19   : > { %p1365_p13 = pnand %p1363_p12, %p1360_p11 }
  0x1b   : > { %1368 = shalt.err (!%p1365_p13)
}
  0x1c   : > { %s1369_s12 = scalar_lea.vmem %s187_s26, 256  ;;  %p1377_p6 = scmp.lt.s32.totalorder %s187_s26, %s187_s26 }
  0x1d   : > { %p1370_p0 = scmp.ne.s32.totalorder %s187_s26, %s1369_s12  ;;  %p1378_p1 = scmp.lt.s32.totalorder %s1369_s12, %s1369_s12 }
  0x1f   : > { %p1372_p2 = pnand %p1370_p0, %p1358_p9  ;;  %p1379_p4 = por %p1378_p1, %p1377_p6 }
  0x21   : > { %p1373_p3 = pneg %p1372_p2 }
  0x23   : > { %p1380_p5 = pnand %p1379_p4, %p1373_p3 }
  0x25   : > { %1383 = shalt.err (!%p1380_p5)
}
  0x26   : > { %s1853_s13 = smov 128   ;;  %s1523_s14 = smov 8  }
  0x27   : > { %1304 = dma.hbm_to_vmem [thread:$0]  (!%p1595_p7), %s1846_s2, 256, %s187_s26, [#allocation5], %s1853_s13, %s1853_s13, %s1523_s14  }
  0x28   : > { %s1384_s25 = scalar_lea.hbm %s1847_s3, 1024 }
  0x29   : > { %p1385_p1 = scmp.ne.s32.totalorder %s1847_s3, %s1384_s25  ;;  %p1391_p8 = scmp.lt.u32.totalorder %s1384_s25, %s1847_s3 }
  0x2b   : > { %p1387_p4 = pnand %p1385_p1, %p1358_p9 }
  0x2d   : > { %p1388_p5 = pneg %p1387_p4 }
  0x2f   : > { %p1393_p10 = pnand %p1391_p8, %p1388_p5 }
  0x31   : > { %1396 = shalt.err (!%p1393_p10)
}
  0x32   : > { %s1397_s26 = scalar_lea.vmem %s1599_s29, 1024  ;;  %p1405_p0 = scmp.lt.s32.totalorder %s1599_s29, %s1599_s29 }
  0x33   : > { %p1398_p11 = scmp.ne.s32.totalorder %s1599_s29, %s1397_s26  ;;  %p1406_p2 = scmp.lt.s32.totalorder %s1397_s26, %s1397_s26 }
  0x35   : > { %p1400_p12 = pnand %p1398_p11, %p1358_p9  ;;  %p1407_p3 = por %p1406_p2, %p1405_p0 }
  0x37   : > { %p1401_p13 = pneg %p1400_p12 }
  0x39   : > { %p1408_p6 = pnand %p1407_p3, %p1401_p13 }
  0x3b   : > { %1411 = shalt.err (!%p1408_p6)
}
  0x3c   : > { %1307 = dma.hbm_to_vmem [thread:$0]  (!%p1595_p7), %s1847_s3, 1024, %s1599_s29, [#allocation8], %s1853_s13, %s1853_s13, %s1523_s14  }
  0x3d   : > { %s1655_s10 = sadd.s32 1, %s1518_s21   ;;  %s30_s27 = sadd.s32 1, %s1514_s20 }
  0x3e   : > { %s27_s11 = ssub.s32 %s1518_s21, %s1655_s10  ;;  %p37_p9 = scmp.ne.s32.totalorder %s1514_s20, %s1510_s19 }
  0x3f   : > { %p28_p1 = scmp.eq.s32.totalorder %s27_s11, 0  ;;  %p38_p4 = scmp.eq.s32.totalorder %s1518_s21, 0 }
  0x40   : > { %p1317_p5 = scmp.lt.s32.totalorder %s1518_s21, 2  ;;  %s213_s12 = sand.u32 1, %s1514_s20  }
  0x41   : > { %s1666_s15 = scalar_select %p28_p1, %s1514_s20, %s30_s27  }
  0x42   : > { %p39_p8 = por %p38_p4, %p37_p9  ;;  %s1668_s16 = sshll.u32 %s213_s12, 6 }
  0x43   : > { %s1099_s17 = sshll.u32 %s1518_s21, 10  ;;  %s1859_s0 = sld [smem:[#allocation13_spill]] }
  0x44   : > { %s217_s28 = scalar_lea.vmem [#allocation2], %s1668_s16  ;;  %p1677_p7 = pnand %p1317_p5, %p39_p8 }
  0x45   : > { %s224_s30 = sshll.u32 %s217_s28, 4  ;;  %s1686_s8 = scalar_lea.hbm %s1845_s1, %s1099_s17  ;;  %s1681_s30 = int_to_ptr.vmem [resolvable:$true] %s224_s30 }
  0x46   : > { %s1688_s9 = scalar_lea.sflag [#allocation3], %s213_s12  ;;  %p1414_p11 = pneg %p1677_p7 }
  0x49   : > { %s1674_s29 = scalar_lea.hbm %s1859_s0, %s1099_s17  ;;  %s1417_s25 = scalar_lea.hbm %s1859_s0, 2048 }
  0x4a   : > { %s1412_s27 = scalar_lea.hbm %s1674_s29, 1024  ;;  %p1418_p0 = scmp.lt.u32.totalorder %s1674_s29, %s1859_s0 }
  0x4b   : > { %p1413_p10 = scmp.ne.s32.totalorder %s1674_s29, %s1412_s27  ;;  %p1419_p2 = scmp.lt.u32.totalorder %s1417_s25, %s1412_s27 }
  0x4c   : > { %p1421_p6 = scmp.lt.u32.totalorder %s1412_s27, %s1674_s29 }
  0x4d   : > { %p1415_p12 = pnand %p1414_p11, %p1413_p10  ;;  %p1420_p3 = por %p1419_p2, %p1418_p0 }
  0x4f   : > { %p1416_p13 = pneg %p1415_p12  ;;  %p1422_p9 = por %p1421_p6, %p1420_p3 }
  0x51   : > { %p1423_p1 = pnand %p1422_p9, %p1416_p13 }
  0x53   : > { %1426 = shalt.err (!%p1423_p1)
}
  0x54   : > { %s1427_s12 = scalar_lea.vmem %s1681_s30, 1024  ;;  %s1524_s17 = smov [#allocation2]  }
  0x55   : > { %p1428_p4 = scmp.ne.s32.totalorder %s1681_s30, %s1427_s12  ;;  %s1432_s7 = sshll.u32 %s1524_s17, 4  ;;  %s1433_s7 = int_to_ptr.vmem [resolvable:$false] %s1432_s7 }
  0x56   : > { %s1434_s13 = scalar_lea.vmem %s1433_s7, 2048  ;;  %p1435_p10 = scmp.lt.s32.totalorder %s1681_s30, %s1433_s7 }
  0x57   : > { %p1430_p5 = pnand %p1428_p4, %p1414_p11  ;;  %p1436_p12 = scmp.lt.s32.totalorder %s1434_s13, %s1427_s12 }
  0x59   : > { %p1431_p8 = pneg %p1430_p5  ;;  %p1437_p0 = por %p1436_p12, %p1435_p10 }
  0x5b   : > { %p1438_p2 = pnand %p1437_p0, %p1431_p8 }
  0x5d   : > { %1441 = shalt.err (!%p1438_p2)
}
  0x5e   : > { %s1861_s26 = smov 128   ;;  %s238_s27 = scalar_lea.vmem [#allocation4], %s1668_s16 }
  0x5f   : > { %1311 = dma.hbm_to_vmem [thread:$0]  (!%p1677_p7), %s1674_s29, 1024, %s1681_s30, %s1688_s9, %s1861_s26, %s1861_s26, %s1523_s14  }
  0x60   : > { %s245_s11 = sshll.u32 %s238_s27, 4  ;;  %s234_s18 = sand.u32 1, %s1518_s21   ;;  %s1721_s11 = int_to_ptr.vmem [resolvable:$true] %s245_s11 }
  0x61   : > { %s1723_s25 = scalar_lea.sflag [#allocation5], %s234_s18  ;;  %s1442_s28 = scalar_lea.hbm %s1686_s8, 1024 }
  0x62   : > { %p1443_p13 = scmp.ne.s32.totalorder %s1686_s8, %s1442_s28  ;;  %s1447_s7 = scalar_lea.hbm %s1845_s1, 2048 }
  0x63   : > { %p1448_p9 = scmp.lt.u32.totalorder %s1686_s8, %s1845_s1  ;;  %p1449_p1 = scmp.lt.u32.totalorder %s1447_s7, %s1442_s28 }
  0x64   : > { %p1445_p3 = pnand %p1443_p13, %p1414_p11  ;;  %p1451_p5 = scmp.lt.u32.totalorder %s1442_s28, %s1686_s8 }
  0x65   : > { %p1450_p4 = por %p1449_p1, %p1448_p9 }
  0x66   : > { %p1446_p6 = pneg %p1445_p3 }
  0x67   : > { %p1452_p8 = por %p1451_p5, %p1450_p4 }
  0x69   : > { %p1453_p10 = pnand %p1452_p8, %p1446_p6 }
  0x6b   : > { %1456 = shalt.err (!%p1453_p10)
}
  0x6c   : > { %s1457_s21 = scalar_lea.vmem %s1721_s11, 1024  ;;  %s1525_s16 = smov [#allocation4]  }
  0x6d   : > { %p1458_p12 = scmp.ne.s32.totalorder %s1721_s11, %s1457_s21  ;;  %s1462_s29 = sshll.u32 %s1525_s16, 4  ;;  %s1463_s29 = int_to_ptr.vmem [resolvable:$false] %s1462_s29 }
  0x6e   : > { %s1464_s0 = scalar_lea.vmem %s1463_s29, 2048  ;;  %p1465_p13 = scmp.lt.s32.totalorder %s1721_s11, %s1463_s29 }
  0x6f   : > { %p1460_p0 = pnand %p1458_p12, %p1414_p11  ;;  %p1466_p3 = scmp.lt.s32.totalorder %s1464_s0, %s1457_s21 }
  0x71   : > { %p1461_p2 = pneg %p1460_p0  ;;  %p1467_p9 = por %p1466_p3, %p1465_p13 }
  0x73   : > { %p1468_p1 = pnand %p1467_p9, %p1461_p2 }
  0x75   : > { %1471 = shalt.err (!%p1468_p1)
}
  0x76   : > { %1314 = dma.hbm_to_vmem [thread:$0]  (!%p1677_p7), %s1686_s8, 1024, %s1721_s11, %s1723_s25, %s1861_s26, %s1861_s26, %s1523_s14  }
  0x77   : > { %p1862_p11 = scmp.ne.s32.totalorder %s1857_s24, 0 }
  0x78   : > { %s259_s30 = sand.u32 (!%p1862_p11), 1, %s1510_s19   ;;  %p1863_p6 = scmp.ne.s32.totalorder (!%p1862_p11), %s1856_s23, 0 }
  0x79   : > { %257 = sbr.rel (%p1862_p11) target bundleno = 616 (0x268), region = 36  ;;  %s1057_s9 = sshll.u32 (!%p1862_p11), %s259_s30, 6 }
  0x7a   : > { %s260_s27 = scalar_lea.sflag (!%p1862_p11), [#allocation3], %s259_s30  ;;  %s1755_s18 = scalar_lea.vmem (!%p1862_p11), [#allocation2], %s1057_s9 }
  0x80   : > { %1489 = dma.done.wait (%p1863_p6), %s260_s27, 1024  }
  0x81   : > { %1491 = vsyncadd (%p1863_p6), %s260_s27, 4294966272  ;;  %s268_s6 = sand.u32 1, %s1575_s22   ;;  %s1762_s14 = scalar_lea.vmem [#allocation4], %s1057_s9 }
  0x82   : > { %s269_s28 = scalar_lea.sflag [#allocation5], %s268_s6 }
  0x83   : > { %1493 = dma.done.wait (%p1863_p6), %s269_s28, 1024  }
  0x84   : > { %1495 = vsyncadd (%p1863_p6), %s269_s28, 4294966272  ;;  %p1864_p7 = scmp.eq.s32.totalorder %s1575_s22, 0 }
  0x86   : > { %1497 = dma.done.wait (%p1864_p7), [#allocation5], 256   ;;  %p1865_p4 = pmov %p1864_p7 }
  0x88   : > { %1499 = vsyncadd (%p1865_p4), [#allocation5], 4294967040  ;;  %p1866_p5 = pmov %p1865_p4 }
  0x89   : > { %p1867_p8 = pmov %p1865_p4 }
  0x8a   : > { %1501 = dma.done.wait (%p1866_p5), [#allocation8], 1024  }
  0x8b   : > { %1503 = vsyncadd (%p1867_p8), [#allocation8], 4294966272  ;;  %vm341_vm0 = vcmask 130048   ;;  %v339_v0 = vld [vmem:[#allocation6] sm:$0xff]  ;;  %v340_v1 = vld [vmem:[#allocation6 + $0x8] sm:$0xff]  ;;  %vm479_vm1 = vcmask 523264  }
  0x8c   : > { %v331_v2 = vld [vmem:[%s1755_s18] sm:$0xff]  ;;  %v1241_v3 = vpack.c.bf16 %v340_v1, %v339_v0  ;;  %v332_v4 = vld [vmem:[%s1755_s18 + $0x8] sm:$0xff]  ;;  %v333_v5 = vld [vmem:[%s1755_s18 + $0x10] sm:$0xff]  ;;  %s1061_s23 = sshll.u32 %s1575_s22, 3 }
  0x8d   : > { %1157 = vmatprep.mubr.msk.f32.mxu0 %vm341_vm0, %v331_v2  ;;  %v334_v6 = vld [vmem:[%s1755_s18 + $0x18] sm:$0xff]  ;;  %v335_v7 = vld [vmem:[%s1755_s18 + $0x20] sm:$0xff]  ;;  %v336_v8 = vld [vmem:[%s1755_s18 + $0x28] sm:$0xff]  ;;  %p320_p10 = scmp.lt.s32.totalorder %s1061_s23, 15 }
  0x8e   : > { %1242 = vmatprep.subr.bf16.mxu0 %v1241_v3  ;;  %v337_v9 = vld [vmem:[%s1755_s18 + $0x30] sm:$0xff]  ;;  %v338_v10 = vld [vmem:[%s1755_s18 + $0x38] sm:$0xff]  ;;  %v617_v11 = vld [vmem:[%s1762_s14] sm:$0xff] }
  0x8f   : > { %1244 = vmatpush3.bf16.msra.mxu0 %v1241_v3  ;;  %v618_v12 = vld [vmem:[%s1762_s14 + $0x8] sm:$0xff]  ;;  %v619_v13 = vld [vmem:[%s1762_s14 + $0x10] sm:$0xff]  ;;  %v620_v14 = vld [vmem:[%s1762_s14 + $0x18] sm:$0xff]  ;;  %s1873_s23 = smov (!%p320_p10, %s1061_s23), 15 }
  0x90   : > { %1262 = vmatprep.subr.bf16.mxu0 %v1241_v3  ;;  %v621_v15 = vld [vmem:[%s1762_s14 + $0x20] sm:$0xff]  ;;  %v622_v16 = vld [vmem:[%s1762_s14 + $0x28] sm:$0xff]  ;;  %v623_v17 = vld [vmem:[%s1762_s14 + $0x30] sm:$0xff]  ;;  %s1062_s24 = sshll.u32 %s1873_s23, 3 }
  0x91   : > { %v624_v18 = vld [vmem:[%s1762_s14 + $0x38] sm:$0xff]  ;;  %v471_v19 = vld [vmem:[#allocation7] sm:$0xff]  ;;  %v473_v36 = vld [vmem:[#allocation7 + $0x10] sm:$0xff]  ;;  %s323_s11 = scalar_lea.vmem %s1848_s4, %s1062_s24  ;;  %s329_s12 = scalar_lea.vmem %s1849_s5, %s1062_s24 }
  0x92   : > { %1158 = vmatmul.mubr.msk.f32.vlgmr.msra.gmra.mrb[0].mxu0 %vm341_vm0, %v332_v4  ;;  %1185 = vmatprep.mubr.msk.f32.mxu1 %vm479_vm1, %v471_v19  ;;  %v472_v34 = vld [vmem:[#allocation7 + $0x8] sm:$0xff]  ;;  %v474_v39 = vld [vmem:[#allocation7 + $0x18] sm:$0xff]  ;;  %v475_v41 = vld [vmem:[#allocation7 + $0x20] sm:$0xff] }
  0x93   : > { %1264 = vmatpush3.bf16.msra.mxu0 %v1241_v3  ;;  %1160 = vmatprep.mubr.msk.f32.mxu0 %vm341_vm0, %v333_v5  ;;  %v476_v44 = vld [vmem:[#allocation7 + $0x28] sm:$0xff]  ;;  %v477_v46 = vld [vmem:[#allocation7 + $0x30] sm:$0xff]  ;;  %v478_v49 = vld [vmem:[#allocation7 + $0x38] sm:$0xff] }
  0x96   : > { %1161 = vmatmul.mubr.msk.f32.gmra.mrb[2].mxu0 %vm341_vm0, %v334_v6 }
  0x97   : > { %1163 = vmatprep.mubr.msk.f32.mxu0 %vm341_vm0, %v335_v7 }
  0x9a   : > { %1164 = vmatmul.mubr.msk.f32.gmra.mrb[4].mxu0 %vm341_vm0, %v336_v8 }
  0x9b   : > { %1166 = vmatprep.mubr.msk.f32.mxu0 %vm341_vm0, %v337_v9 }
  0x9e   : > { %1167 = vmatmul.mubr.msk.f32.gmra.mrb[6].mxu0 %vm341_vm0, %v338_v10 }
  0x9f   : > { %1201 = vmatprep.mubr.msk.f32.mxu0 %vm341_vm0, %v617_v11 }
  0xa2   : > { %1202 = vmatmul.mubr.msk.f32.vlgmr.msra.gmra.mrb[8].mxu0 %vm341_vm0, %v618_v12 }
  0xa3   : > { %1204 = vmatprep.mubr.msk.f32.mxu0 %vm341_vm0, %v619_v13 }
  0xa6   : > { %1205 = vmatmul.mubr.msk.f32.gmra.mrb[10].mxu0 %vm341_vm0, %v620_v14 }
  0xa7   : > { %1207 = vmatprep.mubr.msk.f32.mxu0 %vm341_vm0, %v621_v15 }
  0xaa   : > { %1208 = vmatmul.mubr.msk.f32.gmra.mrb[12].mxu0 %vm341_vm0, %v622_v16 }
  0xab   : > { %1210 = vmatprep.mubr.msk.f32.mxu0 %vm341_vm0, %v623_v17 }
  0xae   : > { %1211 = vmatmul.mubr.msk.f32.gmra.mrb[14].mxu0 %vm341_vm0, %v624_v18 }
  0xaf   : > { %1229 = vmatprep.mubr.msk.f32.mxu0 %vm479_vm1, %v471_v19 }
 0x165   : > { %v1159_v20 = vpop.f32.mrb[0].mxu0 }
 0x166   : > { %v432_v21 = vpop.f32.mrb[1].mxu0 }
 0x167   : > { %v1245_v22 = vpack.c.bf16 %v1159_v20, %v432_v21 }
 0x169   : > { %v1162_v23 = vpop.f32.mrb[2].mxu0  ;;  %1246 = vmatprep.subr.bf16.mxu1 %v1245_v22 }
 0x16a   : > { %v442_v24 = vpop.f32.mrb[3].mxu0  ;;  %1248 = vmatpush3.bf16.msra.mxu1 %v1245_v22 }
 0x16b   : > { %v1249_v25 = vpack.c.bf16 %v1162_v23, %v442_v24 }
 0x16d   : > { %v1165_v26 = vpop.f32.mrb[4].mxu0  ;;  %1250 = vmatprep.subr.bf16.mxu1 %v1249_v25 }
 0x16e   : > { %v452_v27 = vpop.f32.mrb[5].mxu0  ;;  %1252 = vmatpush3.bf16.msra.mxu1 %v1249_v25 }
 0x16f   : > { %v1253_v28 = vpack.c.bf16 %v1165_v26, %v452_v27 }
 0x171   : > { %v1168_v29 = vpop.f32.mrb[6].mxu0  ;;  %1254 = vmatprep.subr.bf16.mxu1 %v1253_v28 }
 0x172   : > { %v462_v30 = vpop.f32.mrb[7].mxu0  ;;  %1256 = vmatpush3.bf16.msra.mxu1 %v1253_v28 }
 0x173   : > { %v1257_v31 = vpack.c.bf16 %v1168_v29, %v462_v30 }
 0x175   : > { %1258 = vmatprep.subr.bf16.mxu1 %v1257_v31  ;;  %v1203_v32 = vpop.f32.mrb[8].mxu0 }
 0x176   : > { %1260 = vmatpush3.bf16.msra.mxu1 %v1257_v31  ;;  %v717_v33 = vpop.f32.mrb[9].mxu0 }
 0x177   : > { %v1265_v35 = vpack.c.bf16 %v1203_v32, %v717_v33 }
 0x179   : > { %1186 = vmatmul.mubr.msk.f32.vlgmr.msra.gmra.mrb[0].mxu1 %vm479_vm1, %v472_v34  ;;  %v1206_v37 = vpop.f32.mrb[10].mxu0  ;;  %1266 = vmatprep.subr.bf16.mxu0 %v1265_v35 }
 0x17a   : > { %1281 = vmatprep.subr.bf16.mxu1 %v1265_v35  ;;  %v727_v38 = vpop.f32.mrb[11].mxu0  ;;  %1268 = vmatpush3.bf16.msra.mxu0 %v1265_v35 }
 0x17b   : > { %v1269_v40 = vpack.c.bf16 %v1206_v37, %v727_v38  ;;  %1285 = vmatpush3.bf16.msra.mxu1 %v1265_v35  ;;  %1188 = vmatprep.mubr.msk.f32.mxu1 %vm479_vm1, %v473_v36 }
 0x17d   : > { %1189 = vmatmul.mubr.msk.f32.gmra.mrb[2].mxu1 %vm479_vm1, %v474_v39  ;;  %v1209_v42 = vpop.f32.mrb[12].mxu0  ;;  %1270 = vmatprep.subr.bf16.mxu0 %v1269_v40 }
 0x17e   : > { %1282 = vmatprep.subr.bf16.mxu1 %v1269_v40  ;;  %v737_v43 = vpop.f32.mrb[13].mxu0  ;;  %1272 = vmatpush3.bf16.msra.mxu0 %v1269_v40 }
 0x17f   : > { %v1273_v45 = vpack.c.bf16 %v1209_v42, %v737_v43  ;;  %1286 = vmatpush3.bf16.msra.mxu1 %v1269_v40  ;;  %1191 = vmatprep.mubr.msk.f32.mxu1 %vm479_vm1, %v475_v41 }
 0x181   : > { %1192 = vmatmul.mubr.msk.f32.gmra.mrb[4].mxu1 %vm479_vm1, %v476_v44  ;;  %v1212_v47 = vpop.f32.mrb[14].mxu0  ;;  %1274 = vmatprep.subr.bf16.mxu0 %v1273_v45 }
 0x182   : > { %1283 = vmatprep.subr.bf16.mxu1 %v1273_v45  ;;  %v747_v48 = vpop.f32.mrb[15].mxu0  ;;  %1276 = vmatpush3.bf16.msra.mxu0 %v1273_v45 }
 0x183   : > { %v1277_v50 = vpack.c.bf16 %v1212_v47, %v747_v48  ;;  %1287 = vmatpush3.bf16.msra.mxu1 %v1273_v45  ;;  %1194 = vmatprep.mubr.msk.f32.mxu1 %vm479_vm1, %v477_v46 }
 0x185   : > { %1195 = vmatmul.mubr.msk.f32.gmra.mrb[6].mxu1 %vm479_vm1, %v478_v49  ;;  %1278 = vmatprep.subr.bf16.mxu0 %v1277_v50 }
 0x186   : > { %1284 = vmatprep.subr.bf16.mxu1 %v1277_v50  ;;  %1280 = vmatpush3.bf16.msra.mxu0 %v1277_v50 }
 0x187   : > { %1288 = vmatpush3.bf16.msra.mxu1 %v1277_v50  ;;  %1232 = vmatprep.mubr.msk.f32.mxu1 %vm479_vm1, %v473_v36 }
 0x189   : > { %1230 = vmatmul.mubr.msk.f32.vlgmr.msra.gmra.mrb[16].mxu0 %vm479_vm1, %v472_v34 }
 0x18a   : > { %1233 = vmatmul.mubr.msk.f32.vlgmr.msra.gmra.mrb[8].mxu1 %vm479_vm1, %v474_v39 }
 0x18b   : > { %1235 = vmatprep.mubr.msk.f32.mxu1 %vm479_vm1, %v475_v41 }
 0x18e   : > { %1236 = vmatmul.mubr.msk.f32.gmra.mrb[10].mxu1 %vm479_vm1, %v476_v44 }
 0x18f   : > { %1238 = vmatprep.mubr.msk.f32.mxu1 %vm479_vm1, %v477_v46 }
 0x192   : > { %1239 = vmatmul.mubr.msk.f32.gmra.mrb[12].mxu1 %vm479_vm1, %v478_v49 }
 0x24c   : > { %v1187_v51 = vpop.f32.mrb[0].mxu1 }
 0x24d   : > { %610 = vst [vmem:[%s323_s11 + $0x8] sm:$0xff] %v1187_v51  ;;  %v570_v52 = vpop.f32.mrb[1].mxu1 }
 0x24e   : > { %609 = vst [vmem:[%s323_s11] sm:$0xff] %v570_v52 }
 0x250   : > { %v1190_v53 = vpop.f32.mrb[2].mxu1 }
 0x251   : > { %612 = vst [vmem:[%s323_s11 + $0x18] sm:$0xff] %v1190_v53  ;;  %v580_v54 = vpop.f32.mrb[3].mxu1 }
 0x252   : > { %611 = vst [vmem:[%s323_s11 + $0x10] sm:$0xff] %v580_v54 }
 0x254   : > { %v1193_v55 = vpop.f32.mrb[4].mxu1 }
 0x255   : > { %614 = vst [vmem:[%s323_s11 + $0x28] sm:$0xff] %v1193_v55  ;;  %v590_v56 = vpop.f32.mrb[5].mxu1 }
 0x256   : > { %613 = vst [vmem:[%s323_s11 + $0x20] sm:$0xff] %v590_v56 }
 0x258   : > { %v1196_v57 = vpop.f32.mrb[6].mxu1 }
 0x259   : > { %616 = vst [vmem:[%s323_s11 + $0x38] sm:$0xff] %v1196_v57  ;;  %v600_v58 = vpop.f32.mrb[7].mxu1 }
 0x25a   : > { %615 = vst [vmem:[%s323_s11 + $0x30] sm:$0xff] %v600_v58 }
 0x25c   : > { %v1231_v59 = vpop.f32.mrb[16].mxu0 }
 0x25d   : > { %v1234_v60 = vpop.f32.mrb[8].mxu1  ;;  %894 = vst [vmem:[%s329_s12 + $0x8] sm:$0xff] %v1231_v59  ;;  %v854_v61 = vpop.f32.mrb[17].mxu0 }
 0x25e   : > { %896 = vst [vmem:[%s329_s12 + $0x18] sm:$0xff] %v1234_v60  ;;  %v864_v62 = vpop.f32.mrb[9].mxu1  ;;  %893 = vst [vmem:[%s329_s12] sm:$0xff] %v854_v61 }
 0x25f   : > { %895 = vst [vmem:[%s329_s12 + $0x10] sm:$0xff] %v864_v62 }
 0x261   : > { %v1237_v63 = vpop.f32.mrb[10].mxu1 }
 0x262   : > { %898 = vst [vmem:[%s329_s12 + $0x28] sm:$0xff] %v1237_v63  ;;  %v874_v0 = vpop.f32.mrb[11].mxu1 }
 0x263   : > { %897 = vst [vmem:[%s329_s12 + $0x20] sm:$0xff] %v874_v0 }
 0x265   : > { %v1240_v1 = vpop.f32.mrb[12].mxu1 }
 0x266   : > { %900 = vst [vmem:[%s329_s12 + $0x38] sm:$0xff] %v1240_v1  ;;  %v884_v2 = vpop.f32.mrb[13].mxu1 }
 0x267   : > { %899 = vst [vmem:[%s329_s12 + $0x30] sm:$0xff] %v884_v2 }
 0x268 PF: > { %p20_p12 = scmp.ge.s32.totalorder %s1655_s10, 4   ;;  %s1868_s18 = smov %s1510_s19 }
 0x269   : > { %s1869_s19 = smov %s1514_s20  ;;  %s1870_s20 = smov %s1666_s15 }
 0x26a   : > { %s1871_s21 = smov %s1655_s10  ;;  %22 = sbr.rel (!%p20_p12) target bundleno = 8 (0x8), region = 109 }
 0x271   :  { %940 = vsyncpa [#allocation3], 1 }
 0x272   :  { %942 = vsyncpa [#allocation3 + $0x1], 1 }
 0x273   :  { %943 = vsyncpa [#allocation5], 1 }
 0x274   :  { %945 = vsyncpa [#allocation5 + $0x1], 1 }
 0x275   :  { %946 = vsyncpa [#allocation8], 1 }

</bundles_post_ra>
